<compile_context>
chip_gen: v5e
topology: v5e:2x2
jax: 0.10.0
libtpu: 0.0.40
codegen_flags: <defaults>
</compile_context>

<pallas_src>
import jax
import jax.numpy as jnp
from jax import lax
from jax.experimental import pallas as pl
from jax.experimental.pallas import tpu as pltpu

PADDING_IDX = 0
_NEG_BIG = -1e30  # bias for padded vocab columns (kept in f32: exp underflows to 0)


def _round_up(x, m):
    return ((x + m - 1) // m) * m


# ---------------------------------------------------------------------------
# Fused LM head kernel: LayerNorm + streamed vocab matmul + online-softmax CE
# (+ argmax in eval mode).  grid = (row_tiles, vocab_tiles).
# ---------------------------------------------------------------------------
def _make_lm_kernel(eval_mode, tv, n_vt):
    def kernel(h_ref, labels_ref, gamma_ref, beta_ref, w_ref, b_ref, *rest):
        if eval_mode:
            nll_ref, preds_ref = rest[0], rest[1]
            hn_sc, m_sc, l_sc, lab_sc, bv_sc, bi_sc = rest[2:]
        else:
            nll_ref = rest[0]
            hn_sc, m_sc, l_sc, lab_sc = rest[1:]

        j = pl.program_id(1)

        # ---- init at first vocab tile: LayerNorm once per row tile + state init
        @pl.when(j == 0)
        def _():
            h = h_ref[...]                                            # [tm, H] f32
            hd = h.shape[-1]
            mu = jnp.sum(h, axis=-1, keepdims=True) * (1.0 / hd)
            d = h - mu
            var = jnp.sum(d * d, axis=-1, keepdims=True) * (1.0 / hd)  # centered var
            hn = d * lax.rsqrt(var + 1e-5) * gamma_ref[...] + beta_ref[...]
            hn_sc[...] = hn.astype(hn_sc.dtype)                       # bf16 for MXU
            m_sc[...] = jnp.full_like(m_sc, -jnp.inf)
            l_sc[...] = jnp.zeros_like(l_sc)
            lab_sc[...] = jnp.zeros_like(lab_sc)
            if eval_mode:
                bv_sc[...] = jnp.full_like(bv_sc, -jnp.inf)
                bi_sc[...] = jnp.zeros_like(bi_sc)

        # ---- streamed vocab tile: bf16 matmul, f32 accumulate / bias
        logits = jnp.dot(hn_sc[...], w_ref[...],
                         preferred_element_type=jnp.float32) + b_ref[...]  # [tm, tv]

        labels = labels_ref[...]                                       # [tm, 1] i32
        local_iota = lax.broadcasted_iota(jnp.int32, logits.shape, 1)
        col = local_iota + j * tv                                      # global column

        # Online softmax statistics.
        bm = jnp.max(logits, axis=-1, keepdims=True)                   # [tm, 1]
        m_new = jnp.maximum(m_sc[...], bm)
        alpha = jnp.exp(m_sc[...] - m_new)
        l_sc[...] = alpha * l_sc[...] + jnp.sum(jnp.exp(logits - m_new),
                                                axis=-1, keepdims=True)
        m_sc[...] = m_new
        # Logit at the label column (compare + where; exactly one hit over all tiles).
        lab_sc[...] += jnp.sum(jnp.where(col == labels, logits, 0.0),
                               axis=-1, keepdims=True)

        if eval_mode:
            # First-occurrence argmax across streamed tiles.
            local_best = jnp.min(jnp.where(logits == bm, local_iota, tv),
                                 axis=-1, keepdims=True)               # [tm, 1] i32
            take = bm > bv_sc[...]
            bi_sc[...] = jnp.where(take, local_best + j * tv, bi_sc[...])
            bv_sc[...] = jnp.maximum(bv_sc[...], bm)

        # ---- finalize at last vocab tile: masked CE partial + (eval) predictions
        @pl.when(j == n_vt - 1)
        def _():
            lab = labels_ref[...]
            valid = (lab != PADDING_IDX).astype(jnp.float32)           # [tm, 1]
            nll = (m_sc[...] + jnp.log(l_sc[...]) - lab_sc[...]) * valid
            partial = jnp.sum(nll, axis=0, keepdims=True)              # [1, 1]
            nll_ref[...] = jnp.broadcast_to(partial, (1, 128))         # lane-dense
            if eval_mode:
                pred = jnp.where(lab == PADDING_IDX, PADDING_IDX, bi_sc[...])
                preds_ref[...] = pred.astype(jnp.int32)                # [tm, 1]

    return kernel


def _vmem_limit_bytes(tm, H, tv, eval_mode):
    est = 0
    est += 2 * tm * max(H, 128) * 4          # h block (double-buffered, lane-padded)
    est += 2 * tm * 128 * 4                  # labels block
    est += 4 * 8 * max(H, 128) * 4           # gamma + beta
    est += 2 * max(H, 8) * tv * 2            # streamed w_out (bf16)
    est += 2 * 8 * tv * 4                    # streamed b_out
    est += 2 * 8 * 128 * 4                   # nll output block
    est += 2 * tm * 128 * 4                  # preds output block (eval)
    est += tm * max(H, 128) * 2              # hn scratch (bf16)
    est += (6 if eval_mode else 4) * tm * 128 * 4  # per-row scalar scratch
    return min(max(2 * est, 16 * 1024 * 1024), 64 * 1024 * 1024)


def lm_head_and_loss(h_flat, labels_2d, gamma, beta, w_out_bf16, b_out_f32,
                     tm, tv, eval_mode):
    Rp, H = h_flat.shape
    Vp = w_out_bf16.shape[1]
    n_rt = Rp // tm
    n_vt = Vp // tv

    kernel = _make_lm_kernel(eval_mode, tv, n_vt)

    out_shape = [jax.ShapeDtypeStruct((n_rt, 128), jnp.float32)]   # per-tile nll sums
    out_specs = [pl.BlockSpec((1, 128), lambda i, j: (i, 0))]
    if eval_mode:
        out_shape.append(jax.ShapeDtypeStruct((Rp, 1), jnp.int32))  # preds (eval only)
        out_specs.append(pl.BlockSpec((tm, 1), lambda i, j: (i, 0)))

    scratch = [
        pltpu.VMEM((tm, H), jnp.bfloat16),    # normalized hidden (reused per vocab tile)
        pltpu.VMEM((tm, 1), jnp.float32),     # running max
        pltpu.VMEM((tm, 1), jnp.float32),     # running sum-exp
        pltpu.VMEM((tm, 1), jnp.float32),     # logit at label
    ]
    if eval_mode:
        scratch += [pltpu.VMEM((tm, 1), jnp.float32),   # best value
                    pltpu.VMEM((tm, 1), jnp.int32)]     # best index

    return pl.pallas_call(
        kernel,
        out_shape=tuple(out_shape),
        grid=(n_rt, n_vt),
        in_specs=[
            pl.BlockSpec((tm, H), lambda i, j: (i, 0)),   # h rows (constant over j)
            pl.BlockSpec((tm, 1), lambda i, j: (i, 0)),   # labels
            pl.BlockSpec((1, H), lambda i, j: (0, 0)),    # ln gamma
            pl.BlockSpec((1, H), lambda i, j: (0, 0)),    # ln beta
            pl.BlockSpec((H, tv), lambda i, j: (0, j)),   # streamed vocab weight (bf16)
            pl.BlockSpec((1, tv), lambda i, j: (0, j)),   # streamed vocab bias (f32)
        ],
        out_specs=tuple(out_specs),
        scratch_shapes=scratch,
        compiler_params=pltpu.CompilerParams(
            dimension_semantics=("parallel", "arbitrary"),
            vmem_limit_bytes=_vmem_limit_bytes(tm, H, tv, eval_mode),
        ),
    )(h_flat, labels_2d, gamma, beta, w_out_bf16, b_out_f32)


# ---------------------------------------------------------------------------
# MaskedLMModel.forward equivalent
# ---------------------------------------------------------------------------
def masked_lm_forward(params, batch, training=False):
    image = batch["image"]                      # [B, C, H, W] (NCHW, like PyTorch)
    tokens = batch["caption_tokens"].astype(jnp.int32)   # [B, S]
    labels = batch["masked_labels"].astype(jnp.int32)    # [B, S]
    # TODO(synk): caption_lengths accepted but unused — the simplified textual head
    # has no attention mask (the real TextualHead is a transformer decoder).
    _ = batch["caption_lengths"]

    B, C, Hi, Wi = image.shape
    p = params["patch_size"]
    nh, nw = Hi // p, Wi // p

    # Mean-pool patches directly (mean commutes with the linear patch embedding;
    # (c, ph, pw) flattening matches w_patch's Dp layout). No transpose materialized.
    pooled = image.reshape(B, C, nh, p, nw, p).mean(axis=(2, 4)).reshape(B, C * p * p)

    # Fold visual backbone + textual head's visual projection into one matmul.
    w_vis = params["w_patch"] @ params["w_proj"]          # [Dp, H]
    b_vis = params["b_patch"] @ params["w_proj"]          # [1, H]
    vproj = pooled @ w_vis + b_vis                        # [B, H]

    # Glue: token-embedding gather + positional embedding + visual-context add.
    # TODO(synk): could be fused into the LM-head kernel via scalar prefetch of
    # token ids to avoid the R x H activation round-trip.
    emb = jnp.take(params["tok_emb"], tokens, axis=0) + params["pos_emb"][None, :, :]
    h_pre = emb + vproj[:, None, :]                       # [B, S, H]

    Hd = h_pre.shape[-1]
    S = tokens.shape[1]
    R = B * S
    h_flat = h_pre.reshape(R, Hd).astype(jnp.float32)
    labels_2d = labels.reshape(R, 1)

    # Row tile (8-aligned, up to 256 since the vocab weight is streamed).
    tm = min(256, _round_up(R, 8))
    Rp = _round_up(R, tm)
    if Rp != R:
        h_flat = jnp.pad(h_flat, ((0, Rp - R), (0, 0)))
        labels_2d = jnp.pad(labels_2d, ((0, Rp - R), (0, 0)),
                            constant_values=PADDING_IDX)   # padded rows are ignored

    # Vocab tiling: lane-dense tiles; padded columns get a -1e30 f32 bias.
    V = params["w_out"].shape[1]
    Vp = _round_up(V, 128)
    tv = min(Vp, 1024)
    Vp = _round_up(Vp, tv)
    w_out_p = jnp.pad(params["w_out"], ((0, 0), (0, Vp - V))).astype(jnp.bfloat16)
    b_out_p = jnp.pad(params["b_out"], ((0, 0), (0, Vp - V)),
                      constant_values=_NEG_BIG).astype(jnp.float32)

    eval_mode = not training
    outs = lm_head_and_loss(h_flat, labels_2d, params["ln_gamma"], params["ln_beta"],
                            w_out_p, b_out_p, tm, tv, eval_mode)

    nll_partials = outs[0]                                 # [n_row_tiles, 128]
    loss_sum = jnp.sum(nll_partials[:, 0])
    count = jnp.sum((labels != PADDING_IDX).astype(jnp.float32))
    # Matches torch.nn.CrossEntropyLoss(ignore_index=...): NaN if every label ignored.
    loss = loss_sum / count

    out = {
        "loss": loss,
        "loss_components": {"masked_lm": lax.stop_gradient(loss)},
    }
    if eval_mode:
        preds = outs[1]                                    # [Rp, 1] int32
        out["predictions"] = preds[:R, 0].reshape(B, S)
    return out


def init_params(key, *, C=3, patch_size=4, hidden=32, seq=8, vocab=64):
    ks = jax.random.split(key, 6)
    Dp = C * patch_size * patch_size
    return {
        "patch_size": patch_size,
        "w_patch": 0.02 * jax.random.normal(ks[0], (Dp, hidden), jnp.float32),
        "b_patch": jnp.zeros((1, hidden), jnp.float32),
        "tok_emb": 0.02 * jax.random.normal(ks[1], (vocab, hidden), jnp.float32),
        "pos_emb": 0.02 * jax.random.normal(ks[2], (seq, hidden), jnp.float32),
        "w_proj": 0.02 * jax.random.normal(ks[3], (hidden, hidden), jnp.float32),
        "ln_gamma": jnp.ones((1, hidden), jnp.float32),
        "ln_beta": jnp.zeros((1, hidden), jnp.float32),
        "w_out": 0.02 * jax.random.normal(ks[4], (hidden, vocab), jnp.float32),
        "b_out": jnp.zeros((1, vocab), jnp.float32),
    }


if __name__ == "__main__":
    B, C, IMG, S, H, V = 2, 3, 16, 8, 32, 64
    key = jax.random.PRNGKey(0)
    k_param, k_img, k_tok, k_lab, k_msk = jax.random.split(key, 5)

    params = init_params(k_param, C=C, patch_size=4, hidden=H, seq=S, vocab=V)

    image = jax.random.normal(k_img, (B, C, IMG, IMG), jnp.float32)
    caption_tokens = jax.random.randint(k_tok, (B, S), 1, V).astype(jnp.int32)
    caption_lengths = jnp.full((B,), S, jnp.int32)
    masked_labels = jnp.where(
        jax.random.uniform(k_msk, (B, S)) < 0.3,
        jax.random.randint(k_lab, (B, S), 1, V),
        PADDING_IDX,
    ).astype(jnp.int32)
    masked_labels = masked_labels.at[0, 0].set(5)   # guarantee at least one masked token

    batch = {
        "image": image,
        "caption_tokens": caption_tokens,
        "caption_lengths": caption_lengths,
        "masked_labels": masked_labels,
    }

    out = masked_lm_forward(params, batch, training=False)
    jax.block_until_ready(out["loss"])
    jax.block_until_ready(out["predictions"])

    # Also exercise the training variant (no predictions / argmax passes).
    out_train = masked_lm_forward(params, batch, training=True)
    jax.block_until_ready(out_train["loss"])

    print("KERNEL_OK")
</pallas_src>

<mosaic_0001>
module attributes {stable_mosaic.version = 11 : i64} {
  func.func @kernel(%arg0: i32, %arg1: i32, %arg2: memref<16x32xf32, #tpu.memory_space<vmem>>, %arg3: memref<16x1xi32, #tpu.memory_space<vmem>>, %arg4: memref<1x32xf32, #tpu.memory_space<vmem>>, %arg5: memref<1x32xf32, #tpu.memory_space<vmem>>, %arg6: memref<32x128xbf16, #tpu.memory_space<vmem>>, %arg7: memref<1x128xf32, #tpu.memory_space<vmem>>, %arg8: memref<1x128xf32, #tpu.memory_space<vmem>>, %arg9: memref<16x1xi32, #tpu.memory_space<vmem>>, %arg10: memref<16x32xbf16, #tpu.memory_space<vmem>>, %arg11: memref<16x1xf32, #tpu.memory_space<vmem>>, %arg12: memref<16x1xf32, #tpu.memory_space<vmem>>, %arg13: memref<16x1xf32, #tpu.memory_space<vmem>>, %arg14: memref<16x1xf32, #tpu.memory_space<vmem>>, %arg15: memref<16x1xi32, #tpu.memory_space<vmem>>) attributes {dimension_semantics = [#tpu.dimension_semantics<parallel>, #tpu.dimension_semantics<arbitrary>], iteration_bounds = array<i64: 1, 1>, scalar_prefetch = 0 : i64, scratch_operands = 6 : i64, tpu.core_type = #tpu.core_type<tc>, window_params = [{transform_indices = @transform_0, window_bounds = array<i64: 16, 32>}, {transform_indices = @transform_1, window_bounds = array<i64: 16, 1>}, {pipeline_mode = #tpu.pipeline_mode<synchronous>, transform_indices = @transform_2, window_bounds = array<i64: 1, 32>}, {pipeline_mode = #tpu.pipeline_mode<synchronous>, transform_indices = @transform_3, window_bounds = array<i64: 1, 32>}, {transform_indices = @transform_4, window_bounds = array<i64: 32, 128>}, {transform_indices = @transform_5, window_bounds = array<i64: 1, 128>}, {transform_indices = @transform_6, window_bounds = array<i64: 1, 128>}, {transform_indices = @transform_7, window_bounds = array<i64: 16, 1>}]} {
    %c0_i32 = arith.constant 0 : i32
    %0 = arith.cmpi eq, %arg1, %c0_i32 : i32
    %1 = arith.extui %0 : i1 to i32
    %c0_i32_0 = arith.constant 0 : i32
    %2 = arith.cmpi ne, %1, %c0_i32_0 : i32
    scf.if %2 {
      %c0_41 = arith.constant 0 : index
      %c0_42 = arith.constant 0 : index
      %60 = vector.load %arg2[%c0_41, %c0_42] : memref<16x32xf32, #tpu.memory_space<vmem>>, vector<16x32xf32>
      %cst_43 = arith.constant dense<0.000000e+00> : vector<16xf32>
      %61 = vector.multi_reduction <add>, %60, %cst_43 [1] : vector<16x32xf32> to vector<16xf32>
      %62 = vector.shape_cast %61 : vector<16xf32> to vector<16x1xf32>
      %cst_44 = arith.constant 3.125000e-02 : f32
      %63 = vector.broadcast %cst_44 : f32 to vector<16x1xf32>
      %64 = arith.mulf %62, %63 : vector<16x1xf32>
      %65 = vector.broadcast %64 : vector<16x1xf32> to vector<16x32xf32>
      %66 = arith.subf %60, %65 : vector<16x32xf32>
      %67 = arith.mulf %66, %66 : vector<16x32xf32>
      %cst_45 = arith.constant dense<0.000000e+00> : vector<16xf32>
      %68 = vector.multi_reduction <add>, %67, %cst_45 [1] : vector<16x32xf32> to vector<16xf32>
      %69 = vector.shape_cast %68 : vector<16xf32> to vector<16x1xf32>
      %cst_46 = arith.constant 3.125000e-02 : f32
      %70 = vector.broadcast %cst_46 : f32 to vector<16x1xf32>
      %71 = arith.mulf %69, %70 : vector<16x1xf32>
      %cst_47 = arith.constant 9.99999974E-6 : f32
      %72 = vector.broadcast %cst_47 : f32 to vector<16x1xf32>
      %73 = arith.addf %71, %72 : vector<16x1xf32>
      %74 = math.rsqrt %73 : vector<16x1xf32>
      %75 = vector.broadcast %74 : vector<16x1xf32> to vector<16x32xf32>
      %76 = arith.mulf %66, %75 : vector<16x32xf32>
      %c0_48 = arith.constant 0 : index
      %c0_49 = arith.constant 0 : index
      %77 = vector.load %arg4[%c0_48, %c0_49] : memref<1x32xf32, #tpu.memory_space<vmem>>, vector<1x32xf32>
      %78 = vector.broadcast %77 : vector<1x32xf32> to vector<16x32xf32>
      %79 = arith.mulf %76, %78 : vector<16x32xf32>
      %c0_50 = arith.constant 0 : index
      %c0_51 = arith.constant 0 : index
      %80 = vector.load %arg5[%c0_50, %c0_51] : memref<1x32xf32, #tpu.memory_space<vmem>>, vector<1x32xf32>
      %81 = vector.broadcast %80 : vector<1x32xf32> to vector<16x32xf32>
      %82 = arith.addf %79, %81 : vector<16x32xf32>
      %83 = arith.truncf %82 : vector<16x32xf32> to vector<16x32xbf16>
      %c0_52 = arith.constant 0 : index
      %c0_53 = arith.constant 0 : index
      %84 = vector.load %arg10[%c0_52, %c0_53] : memref<16x32xbf16, #tpu.memory_space<vmem>>, vector<16x32xbf16>
      tpu.vector_store %arg10[%c0_52, %c0_53], %83 {strides = array<i32>} : memref<16x32xbf16, #tpu.memory_space<vmem>>, vector<16x32xbf16>,
      %cst_54 = arith.constant 0xFF800000 : f32
      %85 = vector.broadcast %cst_54 : f32 to vector<16x1xf32>
      %c0_55 = arith.constant 0 : index
      %c0_56 = arith.constant 0 : index
      %86 = vector.load %arg11[%c0_55, %c0_56] : memref<16x1xf32, #tpu.memory_space<vmem>>, vector<16x1xf32>
      tpu.vector_store %arg11[%c0_55, %c0_56], %85 {strides = array<i32>} : memref<16x1xf32, #tpu.memory_space<vmem>>, vector<16x1xf32>,
      %cst_57 = arith.constant 0.000000e+00 : f32
      %87 = vector.broadcast %cst_57 : f32 to vector<16x1xf32>
      %c0_58 = arith.constant 0 : index
      %c0_59 = arith.constant 0 : index
      %88 = vector.load %arg12[%c0_58, %c0_59] : memref<16x1xf32, #tpu.memory_space<vmem>>, vector<16x1xf32>
      tpu.vector_store %arg12[%c0_58, %c0_59], %87 {strides = array<i32>} : memref<16x1xf32, #tpu.memory_space<vmem>>, vector<16x1xf32>,
      %cst_60 = arith.constant 0.000000e+00 : f32
      %89 = vector.broadcast %cst_60 : f32 to vector<16x1xf32>
      %c0_61 = arith.constant 0 : index
      %c0_62 = arith.constant 0 : index
      %90 = vector.load %arg13[%c0_61, %c0_62] : memref<16x1xf32, #tpu.memory_space<vmem>>, vector<16x1xf32>
      tpu.vector_store %arg13[%c0_61, %c0_62], %89 {strides = array<i32>} : memref<16x1xf32, #tpu.memory_space<vmem>>, vector<16x1xf32>,
      %cst_63 = arith.constant 0xFF800000 : f32
      %91 = vector.broadcast %cst_63 : f32 to vector<16x1xf32>
      %c0_64 = arith.constant 0 : index
      %c0_65 = arith.constant 0 : index
      %92 = vector.load %arg14[%c0_64, %c0_65] : memref<16x1xf32, #tpu.memory_space<vmem>>, vector<16x1xf32>
      tpu.vector_store %arg14[%c0_64, %c0_65], %91 {strides = array<i32>} : memref<16x1xf32, #tpu.memory_space<vmem>>, vector<16x1xf32>,
      %c0_i32_66 = arith.constant 0 : i32
      %93 = vector.broadcast %c0_i32_66 : i32 to vector<16x1xi32>
      %c0_67 = arith.constant 0 : index
      %c0_68 = arith.constant 0 : index
      %94 = vector.load %arg15[%c0_67, %c0_68] : memref<16x1xi32, #tpu.memory_space<vmem>>, vector<16x1xi32>
      tpu.vector_store %arg15[%c0_67, %c0_68], %93 {strides = array<i32>} : memref<16x1xi32, #tpu.memory_space<vmem>>, vector<16x1xi32>,
    } else {
    }
    %c0 = arith.constant 0 : index
    %c0_1 = arith.constant 0 : index
    %3 = vector.load %arg10[%c0, %c0_1] : memref<16x32xbf16, #tpu.memory_space<vmem>>, vector<16x32xbf16>
    %c0_2 = arith.constant 0 : index
    %c0_3 = arith.constant 0 : index
    %4 = vector.load %arg6[%c0_2, %c0_3] : memref<32x128xbf16, #tpu.memory_space<vmem>>, vector<32x128xbf16>
    %cst = arith.constant dense<0.000000e+00> : vector<16x128xf32>
    %5 = tpu.matmul %3, %4, %cst {dimension_numbers = #tpu.dot_dimension_numbers<[1], [0], [0], [1], [0, 0, 1, 1], [], []>} : vector<16x32xbf16>, vector<32x128xbf16>, vector<16x128xf32> -> vector<16x128xf32>
    %c0_4 = arith.constant 0 : index
    %c0_5 = arith.constant 0 : index
    %6 = vector.load %arg7[%c0_4, %c0_5] : memref<1x128xf32, #tpu.memory_space<vmem>>, vector<1x128xf32>
    %7 = vector.broadcast %6 : vector<1x128xf32> to vector<16x128xf32>
    %8 = arith.addf %5, %7 : vector<16x128xf32>
    %c0_6 = arith.constant 0 : index
    %c0_7 = arith.constant 0 : index
    %9 = vector.load %arg3[%c0_6, %c0_7] : memref<16x1xi32, #tpu.memory_space<vmem>>, vector<16x1xi32>
    %10 = tpu.iota {dimensions = array<i32: 1>} : vector<16x128xi32>
    %c128_i32 = arith.constant 128 : i32
    %11 = arith.muli %arg1, %c128_i32 : i32
    %12 = vector.broadcast %11 : i32 to vector<16x128xi32>
    %13 = arith.addi %10, %12 : vector<16x128xi32>
    %cst_8 = arith.constant dense<0xFF800000> : vector<16xf32>
    %14 = vector.multi_reduction <maximumf>, %8, %cst_8 [1] : vector<16x128xf32> to vector<16xf32>
    %15 = vector.shape_cast %14 : vector<16xf32> to vector<16x1xf32>
    %c0_9 = arith.constant 0 : index
    %c0_10 = arith.constant 0 : index
    %16 = vector.load %arg11[%c0_9, %c0_10] : memref<16x1xf32, #tpu.memory_space<vmem>>, vector<16x1xf32>
    %17 = arith.maximumf %16, %15 : vector<16x1xf32>
    %c0_11 = arith.constant 0 : index
    %c0_12 = arith.constant 0 : index
    %18 = vector.load %arg11[%c0_11, %c0_12] : memref<16x1xf32, #tpu.memory_space<vmem>>, vector<16x1xf32>
    %19 = arith.subf %18, %17 : vector<16x1xf32>
    %20 = math.exp %19 : vector<16x1xf32>
    %c0_13 = arith.constant 0 : index
    %c0_14 = arith.constant 0 : index
    %21 = vector.load %arg12[%c0_13, %c0_14] : memref<16x1xf32, #tpu.memory_space<vmem>>, vector<16x1xf32>
    %22 = arith.mulf %20, %21 : vector<16x1xf32>
    %23 = vector.broadcast %17 : vector<16x1xf32> to vector<16x128xf32>
    %24 = arith.subf %8, %23 : vector<16x128xf32>
    %25 = math.exp %24 : vector<16x128xf32>
    %cst_15 = arith.constant dense<0.000000e+00> : vector<16xf32>
    %26 = vector.multi_reduction <add>, %25, %cst_15 [1] : vector<16x128xf32> to vector<16xf32>
    %27 = vector.shape_cast %26 : vector<16xf32> to vector<16x1xf32>
    %28 = arith.addf %22, %27 : vector<16x1xf32>
    %c0_16 = arith.constant 0 : index
    %c0_17 = arith.constant 0 : index
    %29 = vector.load %arg12[%c0_16, %c0_17] : memref<16x1xf32, #tpu.memory_space<vmem>>, vector<16x1xf32>
    tpu.vector_store %arg12[%c0_16, %c0_17], %28 {strides = array<i32>} : memref<16x1xf32, #tpu.memory_space<vmem>>, vector<16x1xf32>,
    %c0_18 = arith.constant 0 : index
    %c0_19 = arith.constant 0 : index
    %30 = vector.load %arg11[%c0_18, %c0_19] : memref<16x1xf32, #tpu.memory_space<vmem>>, vector<16x1xf32>
    tpu.vector_store %arg11[%c0_18, %c0_19], %17 {strides = array<i32>} : memref<16x1xf32, #tpu.memory_space<vmem>>, vector<16x1xf32>,
    %c0_20 = arith.constant 0 : index
    %c0_21 = arith.constant 0 : index
    %31 = vector.load %arg13[%c0_20, %c0_21] : memref<16x1xf32, #tpu.memory_space<vmem>>, vector<16x1xf32>
    %32 = vector.broadcast %9 : vector<16x1xi32> to vector<16x128xi32>
    %33 = arith.cmpi eq, %13, %32 : vector<16x128xi32>
    %cst_22 = arith.constant 0.000000e+00 : f32
    %34 = vector.broadcast %cst_22 : f32 to vector<16x128xf32>
    %35 = arith.select %33, %8, %34 : vector<16x128xi1>, vector<16x128xf32>
    %cst_23 = arith.constant dense<0.000000e+00> : vector<16xf32>
    %36 = vector.multi_reduction <add>, %35, %cst_23 [1] : vector<16x128xf32> to vector<16xf32>
    %37 = vector.shape_cast %36 : vector<16xf32> to vector<16x1xf32>
    %38 = arith.addf %31, %37 : vector<16x1xf32>
    %c0_24 = arith.constant 0 : index
    %c0_25 = arith.constant 0 : index
    %39 = vector.load %arg13[%c0_24, %c0_25] : memref<16x1xf32, #tpu.memory_space<vmem>>, vector<16x1xf32>
    tpu.vector_store %arg13[%c0_24, %c0_25], %38 {strides = array<i32>} : memref<16x1xf32, #tpu.memory_space<vmem>>, vector<16x1xf32>,
    %40 = vector.broadcast %15 : vector<16x1xf32> to vector<16x128xf32>
    %41 = arith.cmpf oeq, %8, %40 : vector<16x128xf32>
    %c128_i32_26 = arith.constant 128 : i32
    %42 = vector.broadcast %c128_i32_26 : i32 to vector<16x128xi32>
    %43 = arith.select %41, %10, %42 : vector<16x128xi1>, vector<16x128xi32>
    %cst_27 = arith.constant dense<2147483647> : vector<16xi32>
    %44 = vector.multi_reduction <minsi>, %43, %cst_27 [1] : vector<16x128xi32> to vector<16xi32>
    %45 = vector.shape_cast %44 : vector<16xi32> to vector<16x1xi32>
    %c0_28 = arith.constant 0 : index
    %c0_29 = arith.constant 0 : index
    %46 = vector.load %arg14[%c0_28, %c0_29] : memref<16x1xf32, #tpu.memory_space<vmem>>, vector<16x1xf32>
    %47 = arith.cmpf ogt, %15, %46 : vector<16x1xf32>
    %c128_i32_30 = arith.constant 128 : i32
    %48 = arith.muli %arg1, %c128_i32_30 : i32
    %49 = vector.broadcast %48 : i32 to vector<16x1xi32>
    %50 = arith.addi %45, %49 : vector<16x1xi32>
    %c0_31 = arith.constant 0 : index
    %c0_32 = arith.constant 0 : index
    %51 = vector.load %arg15[%c0_31, %c0_32] : memref<16x1xi32, #tpu.memory_space<vmem>>, vector<16x1xi32>
    %52 = arith.select %47, %50, %51 : vector<16x1xi1>, vector<16x1xi32>
    %c0_33 = arith.constant 0 : index
    %c0_34 = arith.constant 0 : index
    %53 = vector.load %arg15[%c0_33, %c0_34] : memref<16x1xi32, #tpu.memory_space<vmem>>, vector<16x1xi32>
    tpu.vector_store %arg15[%c0_33, %c0_34], %52 {strides = array<i32>} : memref<16x1xi32, #tpu.memory_space<vmem>>, vector<16x1xi32>,
    %c0_35 = arith.constant 0 : index
    %c0_36 = arith.constant 0 : index
    %54 = vector.load %arg14[%c0_35, %c0_36] : memref<16x1xf32, #tpu.memory_space<vmem>>, vector<16x1xf32>
    %55 = arith.maximumf %54, %15 : vector<16x1xf32>
    %c0_37 = arith.constant 0 : index
    %c0_38 = arith.constant 0 : index
    %56 = vector.load %arg14[%c0_37, %c0_38] : memref<16x1xf32, #tpu.memory_space<vmem>>, vector<16x1xf32>
    tpu.vector_store %arg14[%c0_37, %c0_38], %55 {strides = array<i32>} : memref<16x1xf32, #tpu.memory_space<vmem>>, vector<16x1xf32>,
    %c0_i32_39 = arith.constant 0 : i32
    %57 = arith.cmpi eq, %arg1, %c0_i32_39 : i32
    %58 = arith.extui %57 : i1 to i32
    %c0_i32_40 = arith.constant 0 : i32
    %59 = arith.cmpi ne, %58, %c0_i32_40 : i32
    scf.if %59 {
      %c0_41 = arith.constant 0 : index
      %c0_42 = arith.constant 0 : index
      %60 = vector.load %arg3[%c0_41, %c0_42] : memref<16x1xi32, #tpu.memory_space<vmem>>, vector<16x1xi32>
      %c0_i32_43 = arith.constant 0 : i32
      %61 = vector.broadcast %c0_i32_43 : i32 to vector<16x1xi32>
      %62 = arith.cmpi ne, %60, %61 : vector<16x1xi32>
      %63 = arith.extui %62 : vector<16x1xi1> to vector<16x1xi32>
      %64 = arith.sitofp %63 : vector<16x1xi32> to vector<16x1xf32>
      %c0_44 = arith.constant 0 : index
      %c0_45 = arith.constant 0 : index
      %65 = vector.load %arg11[%c0_44, %c0_45] : memref<16x1xf32, #tpu.memory_space<vmem>>, vector<16x1xf32>
      %c0_46 = arith.constant 0 : index
      %c0_47 = arith.constant 0 : index
      %66 = vector.load %arg12[%c0_46, %c0_47] : memref<16x1xf32, #tpu.memory_space<vmem>>, vector<16x1xf32>
      %67 = math.log %66 : vector<16x1xf32>
      %68 = arith.addf %65, %67 : vector<16x1xf32>
      %c0_48 = arith.constant 0 : index
      %c0_49 = arith.constant 0 : index
      %69 = vector.load %arg13[%c0_48, %c0_49] : memref<16x1xf32, #tpu.memory_space<vmem>>, vector<16x1xf32>
      %70 = arith.subf %68, %69 : vector<16x1xf32>
      %71 = arith.mulf %70, %64 : vector<16x1xf32>
      %cst_50 = arith.constant dense<0.000000e+00> : vector<1xf32>
      %72 = vector.multi_reduction <add>, %71, %cst_50 [0] : vector<16x1xf32> to vector<1xf32>
      %73 = vector.shape_cast %72 : vector<1xf32> to vector<1x1xf32>
      %74 = vector.shape_cast %73 : vector<1x1xf32> to vector<1x1xf32>
      %75 = vector.broadcast %74 : vector<1x1xf32> to vector<1x128xf32>
      %c0_51 = arith.constant 0 : index
      %c0_52 = arith.constant 0 : index
      %76 = vector.load %arg8[%c0_51, %c0_52] : memref<1x128xf32, #tpu.memory_space<vmem>>, vector<1x128xf32>
      tpu.vector_store %arg8[%c0_51, %c0_52], %75 {strides = array<i32>} : memref<1x128xf32, #tpu.memory_space<vmem>>, vector<1x128xf32>,
      %c0_i32_53 = arith.constant 0 : i32
      %77 = vector.broadcast %c0_i32_53 : i32 to vector<16x1xi32>
      %78 = arith.cmpi eq, %60, %77 : vector<16x1xi32>
      %c0_54 = arith.constant 0 : index
      %c0_55 = arith.constant 0 : index
      %79 = vector.load %arg15[%c0_54, %c0_55] : memref<16x1xi32, #tpu.memory_space<vmem>>, vector<16x1xi32>
      %c0_i32_56 = arith.constant 0 : i32
      %80 = vector.broadcast %c0_i32_56 : i32 to vector<16x1xi32>
      %81 = arith.select %78, %80, %79 : vector<16x1xi1>, vector<16x1xi32>
      %c0_57 = arith.constant 0 : index
      %c0_58 = arith.constant 0 : index
      %82 = vector.load %arg9[%c0_57, %c0_58] : memref<16x1xi32, #tpu.memory_space<vmem>>, vector<16x1xi32>
      tpu.vector_store %arg9[%c0_57, %c0_58], %81 {strides = array<i32>} : memref<16x1xi32, #tpu.memory_space<vmem>>, vector<16x1xi32>,
    } else {
    }
    return
  }
  func.func @transform_0(%arg0: i32, %arg1: i32) -> (i32, i32) {
    %c0_i32 = arith.constant 0 : i32
    %c0_i32_0 = arith.constant 0 : i32
    return %arg0, %c0_i32 : i32, i32
  }
  func.func @transform_1(%arg0: i32, %arg1: i32) -> (i32, i32) {
    %c0_i32 = arith.constant 0 : i32
    %c0_i32_0 = arith.constant 0 : i32
    return %arg0, %c0_i32 : i32, i32
  }
  func.func @transform_2(%arg0: i32, %arg1: i32) -> (i32, i32) {
    %c0_i32 = arith.constant 0 : i32
    %c0_i32_0 = arith.constant 0 : i32
    %c0_i32_1 = arith.constant 0 : i32
    return %c0_i32, %c0_i32_0 : i32, i32
  }
  func.func @transform_3(%arg0: i32, %arg1: i32) -> (i32, i32) {
    %c0_i32 = arith.constant 0 : i32
    %c0_i32_0 = arith.constant 0 : i32
    %c0_i32_1 = arith.constant 0 : i32
    return %c0_i32, %c0_i32_0 : i32, i32
  }
  func.func @transform_4(%arg0: i32, %arg1: i32) -> (i32, i32) {
    %c0_i32 = arith.constant 0 : i32
    %c0_i32_0 = arith.constant 0 : i32
    return %c0_i32, %arg1 : i32, i32
  }
  func.func @transform_5(%arg0: i32, %arg1: i32) -> (i32, i32) {
    %c0_i32 = arith.constant 0 : i32
    %c0_i32_0 = arith.constant 0 : i32
    return %c0_i32, %arg1 : i32, i32
  }
  func.func @transform_6(%arg0: i32, %arg1: i32) -> (i32, i32) {
    %c0_i32 = arith.constant 0 : i32
    %c0_i32_0 = arith.constant 0 : i32
    return %arg0, %c0_i32 : i32, i32
  }
  func.func @transform_7(%arg0: i32, %arg1: i32) -> (i32, i32) {
    %c0_i32 = arith.constant 0 : i32
    %c0_i32_0 = arith.constant 0 : i32
    return %arg0, %c0_i32 : i32, i32
  }
}

</mosaic_0001>

<bundles_post_ra>
// kernel: tpu_custom_call.1
= control target key start
LH: loop header
LB: loop body
LE: loop exit
PB: predicated region body
PF: predicated region fallthrough
CT: control target
= control target key end

     0   :  { %13 = vsyncpa [#allocation9], 0  ;;  %s614_s0 = inlined_call_operand.vmem [shape: f32[16,32], index: 0, kind: input, shape index: {}]   ;;  %s615_s1 = inlined_call_operand.vmem [shape: s32[16,1], index: 1, kind: input, shape index: {}]   ;;  %s616_s2 = inlined_call_operand.vmem [shape: f32[1,32], index: 2, kind: input, shape index: {}]   ;;  %s617_s3 = inlined_call_operand.vmem [shape: f32[1,32], index: 3, kind: input, shape index: {}]   ;;  %s618_s4 = inlined_call_operand.hbm [shape: bf16[32,128], index: 4, kind: input, shape index: {}]   ;;  %s619_s5 = inlined_call_operand.vmem [shape: f32[1,128], index: 5, kind: input, shape index: {}]   ;;  %s620_s6 = inlined_call_operand.hbm [shape: f32[1,128], index: 6, kind: output, shape index: {0}]   ;;  %s621_s7 = inlined_call_operand.vmem [shape: s32[16,1], index: 7, kind: output, shape index: {1}]  }
   0x1   :  { %14 = vsyncpa [#allocation10], 0  ;;  %s27_s26 = sshll.u32 %s618_s4, 4  ;;  %s459_s27 = smov [#allocation8]   ;;  %s28_s26 = int_to_ptr.hbm [resolvable:$true] %s27_s26 }
   0x2   :  { %s29_s28 = sshll.u32 %s459_s27, 4  ;;  %s460_s29 = smov 64   ;;  %s30_s28 = int_to_ptr.vmem [resolvable:$true] %s29_s28 }
   0x3   :  { %s461_s30 = smov 4  }
   0x4   :  { %35 = dma.hbm_to_vmem [thread:$0]  %s28_s26, 256, %s30_s28, [#allocation9], %s460_s29, %s460_s29, %s461_s30  }
   0x5   :  { %455 = dma.done.wait [#allocation9], 256  }
   0x6   :  { %456 = vsyncadd [#allocation9], 4294967040  ;;  %vm49_vm0 = vcmask 261120   ;;  %v47_v0 = vld [vmem:[%s614_s0] sm:$0xff]  ;;  %v48_v2 = vld [vmem:[%s614_s0 + $0x8] sm:$0xff]  ;;  %vm108_vm5 = vcmask 257024   ;;  %v169_v57 = vlaneseq }
   0x7   :  { %v50_v1 = vsel %vm49_vm0, %v47_v0, 0.0  ;;  %v53_v3 = vsel %vm49_vm0, %v48_v2, 0.0  ;;  %v377_v17 = vld [vmem:[#allocation8 + $0x8] sm:$0xff]  ;;  %v376_v20 = vld [vmem:[#allocation8] sm:$0xff]  ;;  %vm111_vm8 = vcmask 7168   ;;  %v462_v47 = vmov 0  }
   0x8   :  { %51 = vadd.xlane.f32.xlu0 %v50_v1  ;;  %159 = vmatpush.bf16.msra.mxu0 %v377_v17  ;;  %v388_v30 = vld [vmem:[%s616_s2] ss:$0 sm:$0xff]  ;;  %120 = vst.msk [vmem:[#allocation7] sm:$0xff] %vm111_vm8, %v462_v47  ;;  %v463_v53 = vmov -inf   ;;  %v544_v55 = vld [vmem:[%s615_s1 + $0x8] sm:$0xff]  ;;  %v464_v56 = vmov 0.0  }
   0x9   :  { %v389_v33 = vld [vmem:[%s617_s3] ss:$0 sm:$0xff]  ;;  %387 = vset.pattern.permute.xlu2 %v462_v47  ;;  %385 = vset.pattern.permute.xlu0 %v462_v47  ;;  %121 = vst.msk [vmem:[#allocation7 + $0x8] sm:$0xff] %vm111_vm8, %v462_v47  ;;  %v170_v60 = vand.u32 127, %v169_v57  ;;  %s465_s20 = smov [#allocation11]   ;;  %s346_s24 = sshll.u32 %s620_s6, 4  ;;  %s347_s24 = int_to_ptr.hbm [resolvable:$true] %s346_s24 }
   0xa   :  { %386 = vset.pattern.permute.xlu1 %v462_v47  ;;  %v390_v48 = vld [vmem:[%s619_s5] ss:$0 sm:$0xff]  ;;  %118 = vst.msk [vmem:[#allocation6] sm:$0xff] %vm111_vm8, %v463_v53  ;;  %s344_s21 = sshll.u32 %s465_s20, 4  ;;  %s345_s21 = int_to_ptr.vmem [resolvable:$true] %s344_s21 }
   0xb   :  { %112 = vst.msk [vmem:[#allocation3] sm:$0xff] %vm111_vm8, %v463_v53  ;;  %v538_v54 = vld [vmem:[%s615_s1] sm:$0xff] }
   0xc   :  { %160 = vmatpush.bf16.msra.mxu0 %v376_v20  ;;  %113 = vst.msk [vmem:[#allocation3 + $0x8] sm:$0xff] %vm111_vm8, %v463_v53 }
   0xd   :  { %119 = vst.msk [vmem:[#allocation6 + $0x8] sm:$0xff] %vm111_vm8, %v463_v53 }
   0xe   :  { %116 = vst.msk [vmem:[#allocation5] sm:$0xff] %vm111_vm8, %v464_v56 }
   0xf   :  { %114 = vst.msk [vmem:[#allocation4] sm:$0xff] %vm111_vm8, %v464_v56 }
  0x10   :  { %54 = vadd.xlane.f32.xlu0 %v53_v3  ;;  %115 = vst.msk [vmem:[#allocation4 + $0x8] sm:$0xff] %vm111_vm8, %v464_v56 }
  0x11   :  { %117 = vst.msk [vmem:[#allocation5 + $0x8] sm:$0xff] %vm111_vm8, %v464_v56  ;;  %v555_v58 = vld [vmem:[#allocation6] sm:$0xff] }
  0x12   :  { %v178_v59 = vld [vmem:[#allocation3] sm:$0xff] }
  0x13   :  { %v179_v3 = vld [vmem:[#allocation3 + $0x8] sm:$0xff] }
  0x7b   :  { %v52_v4 = vpop.xlane.xlu0 %51 }
  0x7c   :  { %v56_v5 = vmul.f32 0.03125, %v52_v4 }
  0x7e   :  { %v58_v6 = vsub.f32 %v47_v0, %v56_v5 }
  0x80   :  { %v60_v7 = vmul.f32 %v58_v6, %v58_v6 }
  0x82   :  { %v62_v8 = vsel %vm49_vm0, %v60_v7, 0.0 }
  0x83   :  { %63 = vadd.xlane.f32.xlu1 %v62_v8  ;;  %v55_v9 = vpop.xlane.xlu0 %54 }
  0x84   :  { %v57_v10 = vmul.f32 0.03125, %v55_v9 }
  0x86   :  { %v59_v11 = vsub.f32 %v48_v2, %v57_v10  ;;  %v569_v2 = vld [vmem:[#allocation6 + $0x8] sm:$0xff] }
  0x88   :  { %v61_v12 = vmul.f32 %v59_v11, %v59_v11 }
  0x8a   :  { %v65_v13 = vsel %vm49_vm0, %v61_v12, 0.0 }
  0x8b   :  { %66 = vadd.xlane.f32.xlu1 %v65_v13 }
  0xf6   :  { %v64_v14 = vpop.xlane.xlu1 %63 }
  0xf7   :  { %v68_v15 = vmul.f32 0.03125, %v64_v14 }
  0xf9   :  { %v70_v16 = vadd.f32 1e-05, %v68_v15 }
  0xfb   :  { %391 = vrsqrt.f32 %v70_v16  ;;  %vm78_vm2 = vweird.f32 %v70_v16 }
  0xfe   :  { %v67_v18 = vpop.xlane.xlu1 %66 }
  0xff   :  { %v69_v19 = vmul.f32 0.03125, %v67_v18 }
 0x101   :  { %v392_v21 = vpop.eup %391  ;;  %v71_v22 = vadd.f32 1e-05, %v69_v19 }
 0x102   :  { %v73_v23 = vmul.f32 %v392_v21, %v70_v16  ;;  %vm79_vm1 = vweird.f32 %v392_v21 }
 0x103   :  { %393 = vrsqrt.f32 %v71_v22  ;;  %vm80_vm3 = vmor %vm78_vm2, %vm79_vm1  ;;  %vm88_vm6 = vweird.f32 %v71_v22  ;;  %vm294_vm1 = vcmp.ne.s32.totalorder %v538_v54, 0  ;;  %vm295_vm2 = vcmp.ne.s32.totalorder %v544_v55, 0 }
 0x104   :  { %v74_v24 = vmul.f32 %v392_v21, %v73_v23 }
 0x106   :  { %v75_v25 = vmul.f32 0.5, %v74_v24 }
 0x108   :  { %v76_v26 = vsub.f32 1.5, %v75_v25  ;;  %v219_v25 = vld [vmem:[#allocation5] sm:$0xff] }
 0x109   :  { %v394_v27 = vpop.eup %393 }
 0x10a   :  { %v77_v28 = vmul.f32 %v392_v21, %v76_v26  ;;  %v83_v29 = vmul.f32 %v394_v27, %v71_v22  ;;  %vm89_vm4 = vweird.f32 %v394_v27 }
 0x10b   :  { %vm90_vm7 = vmor %vm88_vm6, %vm89_vm4  ;;  %vm331_vm4 = vcmp.eq.s32.totalorder %v538_v54, 0 }
 0x10c   :  { %v81_v31 = vsel %vm80_vm3, %v392_v21, %v77_v28  ;;  %v84_v32 = vmul.f32 %v394_v27, %v83_v29  ;;  %vm332_vm3 = vcmp.eq.s32.totalorder %v544_v55, 0 }
 0x10d   :  { %v92_v34 = vmul.f32 %v81_v31, %v58_v6  ;;  %v188_v31 = vld [vmem:[#allocation4] sm:$0xff] }
 0x10e   :  { %v85_v35 = vmul.f32 0.5, %v84_v32 }
 0x10f   :  { %v98_v36 = vmul.f32 %v388_v30, %v92_v34 }
 0x110   :  { %v86_v37 = vsub.f32 1.5, %v85_v35 }
 0x111   :  { %v104_v38 = vadd.f32 %v389_v33, %v98_v36  ;;  %v189_v36 = vld [vmem:[#allocation4 + $0x8] sm:$0xff] }
 0x112   :  { %v87_v39 = vmul.f32 %v394_v27, %v86_v37  ;;  %v220_v37 = vld [vmem:[#allocation5 + $0x8] sm:$0xff] }
 0x113   :  { %v106_v40 = vpack.c.bf16 %v104_v38, %v104_v38 }
 0x114   :  { %v91_v41 = vsel %vm90_vm7, %v394_v27, %v87_v39 }
 0x115   :  { %109 = vst.msk [vmem:[#allocation2] sm:$0xf] %vm108_vm5, %v106_v40  ;;  %v93_v42 = vmul.f32 %v91_v41, %v59_v11 }
 0x117   :  { %v99_v43 = vmul.f32 %v388_v30, %v93_v42 }
 0x119   :  { %v105_v44 = vadd.f32 %v389_v33, %v99_v43 }
 0x11b   :  { %v107_v45 = vpack.c.bf16 %v105_v44, %v105_v44 }
 0x11d   :  { %110 = vst.msk [vmem:[#allocation2 + $0x4] sm:$0xf] %vm108_vm5, %v107_v45 }
 0x124   :  { %v375_v46 = vld [vmem:[#allocation2] sm:$0xff] }
 0x125   :  { %372 = vmatmul.msk.bf16.vlgmr.msra.gmra.mxu0 %vm49_vm0, %v375_v46 }
 0x1a2   :  { %v162_v49 = vpop.f32.mrf.mxu0 }
 0x1a3   :  { %v163_v50 = vadd.f32 %v390_v48, %v162_v49 }
 0x1a5   :  { %174 = vmax.xlane.f32.xlu2 %v163_v50 }
 0x1aa   :  { %v164_v51 = vpop.f32.mrf.mxu0 }
 0x1ab   :  { %v165_v52 = vadd.f32 %v390_v48, %v164_v51 }
 0x1ad   :  { %176 = vmax.xlane.f32.xlu2 %v165_v52 }
 0x1c5   :  { %222 = vperm.xlu2 %387, %v538_v54  }
 0x1cd   :  { %225 = vperm.xlu2 %387, %v544_v55  }
 0x218   :  { %v557_v61 = vpop.xlane.xlu2 %174 }
 0x219   :  { %vm273_vm9 = vcmp.gt.f32.partialorder %v557_v61, %v555_v58  ;;  %v285_v62 = vmax.f32 %v555_v58, %v557_v61  ;;  %v180_v63 = vmax.f32 %v178_v59, %v557_v61  ;;  %vm239_vm10 = vcmp.eq.f32.partialorder %v163_v50, %v557_v61 }
 0x21a   :  { %v565_v0 = vsel %vm239_vm10, %v170_v60, 128 }
 0x21b   :  { %287 = vst.msk [vmem:[#allocation6] sm:$0xff] %vm111_vm8, %v285_v62  ;;  %194 = vperm.xlu0 %385, %v180_v63   ;;  %v182_v1 = vsub.f32 %v178_v59, %v180_v63  ;;  %v244_v21 = vshra.s32 %v565_v0, 16  ;;  %v243_v45 = vand.u32 65535, %v565_v0 }
 0x21c   :  { %217 = vst.msk [vmem:[#allocation3] sm:$0xff] %vm111_vm8, %v180_v63 }
 0x21d   :  { %v246_v23 = vcvt.s32.f32 %v244_v21  ;;  %v184_v28 = vmul.f32 1.442695, %v182_v1  ;;  %v245_v49 = vcvt.s32.f32 %v243_v45 }
 0x220   :  { %v571_v4 = vpop.xlane.xlu2 %176 }
 0x221   :  { %vm274_vm11 = vcmp.gt.f32.partialorder %v571_v4, %v569_v2  ;;  %v286_v5 = vmax.f32 %v569_v2, %v571_v4  ;;  %v181_v6 = vmax.f32 %v179_v3, %v571_v4  ;;  %vm240_vm12 = vcmp.eq.f32.partialorder %v165_v52, %v571_v4 }
 0x222   :  { %v242_v7 = vsel %vm240_vm12, %v170_v60, 128 }
 0x223   :  { %288 = vst.msk [vmem:[#allocation6 + $0x8] sm:$0xff] %vm111_vm8, %v286_v5  ;;  %199 = vperm.xlu1 %386, %v181_v6   ;;  %v183_v8 = vsub.f32 %v179_v3, %v181_v6  ;;  %v258_v22 = vshra.s32 %v242_v7, 16  ;;  %v257_v44 = vand.u32 65535, %v242_v7  ;;  %v300_v59 = vld [vmem:[#allocation3] sm:$0xff]  ;;  %v373_v3 = vsel %vm294_vm1, 1.0, %v464_v56 }
 0x224   :  { %218 = vst.msk [vmem:[#allocation3 + $0x8] sm:$0xff] %vm111_vm8, %v181_v6  ;;  %v374_v7 = vsel %vm295_vm2, 1.0, %v464_v56 }
 0x225   :  { %v260_v24 = vcvt.s32.f32 %v258_v22  ;;  %v186_v29 = vmul.f32 1.442695, %v183_v8  ;;  %v259_v48 = vcvt.s32.f32 %v257_v44 }
 0x228   :  { %v223_v9 = vpop.permute.xlu2 %222 }
 0x229   :  { %vm227_vm13 = vcmp.eq.s32.totalorder %v170_v60, %v223_v9 }
 0x22a   :  { %v229_v10 = vsel %vm227_vm13, %v163_v50, 0.0 }
 0x22b   :  { %v301_v5 = vld [vmem:[#allocation3 + $0x8] sm:$0xff] }
 0x230   :  { %v226_v18 = vpop.permute.xlu2 %225 }
 0x231   :  { %vm228_vm14 = vcmp.eq.s32.totalorder %v170_v60, %v226_v18 }
 0x232   :  { %v230_v20 = vsel %vm228_vm14, %v165_v52, 0.0 }
 0x245   :  { %231 = vadd.xlane.f32.xlu0 %v229_v10 }
 0x28d   :  { %v195_v11 = vpop.permute.xlu0 %194 }
 0x28e   :  { %v202_v12 = vsub.f32 %v163_v50, %v195_v11 }
 0x290   :  { %v204_v13 = vmul.f32 1.442695, %v202_v12 }
 0x292   :  { %395 = vpow2.f32 %v204_v13 }
 0x295   :  { %v200_v14 = vpop.permute.xlu1 %199 }
 0x296   :  { %v203_v15 = vsub.f32 %v165_v52, %v200_v14 }
 0x298   :  { %v396_v16 = vpop.eup %395  ;;  %v206_v17 = vmul.f32 1.442695, %v203_v15 }
 0x299   :  { %208 = vadd.xlane.f32.xlu1 %v396_v16 }
 0x29a   :  { %397 = vpow2.f32 %v206_v17 }
 0x29b   :  { %399 = vpow2.f32 %v184_v28  ;;  %v278_v28 = vld [vmem:[#allocation7 + $0x8] sm:$0xff] }
 0x29c   :  { %401 = vpow2.f32 %v186_v29  ;;  %v277_v29 = vld [vmem:[#allocation7] sm:$0xff] }
 0x2a0   :  { %v398_v19 = vpop.eup %397 }
 0x2a1   :  { %210 = vadd.xlane.f32.xlu2 %v398_v19  ;;  %233 = vadd.xlane.f32.xlu1 %v230_v20  ;;  %v400_v30 = vpop.eup %399 }
 0x2a2   :  { %v190_v32 = vmul.f32 %v400_v30, %v188_v31  ;;  %v402_v35 = vpop.eup %401 }
 0x2a3   :  { %v191_v38 = vmul.f32 %v402_v35, %v189_v36 }
 0x2a9   :  { %247 = vmin.xlane.f32.xlu2 %v246_v23  ;;  %261 = vmin.xlane.f32.xlu1 %v260_v24 }
 0x2b8   :  { %v232_v26 = vpop.xlane.xlu0 %231 }
 0x2b9   :  { %v235_v27 = vadd.f32 %v232_v26, %v219_v25 }
 0x2bb   :  { %237 = vst.msk [vmem:[#allocation5] sm:$0xff] %vm111_vm8, %v235_v27 }
 0x2c2   :  { %v310_v63 = vld [vmem:[#allocation5] sm:$0xff] }
 0x30c   :  { %v209_v33 = vpop.xlane.xlu1 %208 }
 0x30d   :  { %v212_v34 = vadd.f32 %v209_v33, %v190_v32 }
 0x30f   :  { %215 = vst.msk [vmem:[#allocation4] sm:$0xff] %vm111_vm8, %v212_v34 }
 0x314   :  { %v234_v39 = vpop.xlane.xlu1 %233  ;;  %v211_v40 = vpop.xlane.xlu2 %210 }
 0x315   :  { %v236_v41 = vadd.f32 %v234_v39, %v220_v37  ;;  %v213_v42 = vadd.f32 %v211_v40, %v191_v38 }
 0x316   :  { %v302_v43 = vld [vmem:[#allocation4] sm:$0xff] }
 0x317   :  { %238 = vst.msk [vmem:[#allocation5 + $0x8] sm:$0xff] %vm111_vm8, %v236_v41  ;;  %403 = vlog2.f32 %v302_v43 }
 0x318   :  { %216 = vst.msk [vmem:[#allocation4 + $0x8] sm:$0xff] %vm111_vm8, %v213_v42 }
 0x31c   :  { %v262_v46 = vpop.xlane.xlu1 %261  ;;  %v248_v47 = vpop.xlane.xlu2 %247 }
 0x31d   :  { %v404_v50 = vpop.eup %403  ;;  %vm263_vm15 = vcmp.eq.f32.partialorder %v260_v24, %v262_v46  ;;  %vm249_vm0 = vcmp.eq.f32.partialorder %v246_v23, %v248_v47  ;;  %v268_v21 = vcvt.f32.s32 %v262_v46  ;;  %v254_v22 = vcvt.f32.s32 %v248_v47 }
 0x31e   :  { %v264_v51 = vsel %vm263_vm15, %v259_v48, inf  ;;  %v250_v52 = vsel %vm249_vm0, %v245_v49, inf  ;;  %v305_v57 = vmul.f32 0.6931472, %v404_v50  ;;  %v311_v8 = vld [vmem:[#allocation5 + $0x8] sm:$0xff] }
 0x31f   :  { %265 = vmin.xlane.f32.xlu0 %v264_v51  ;;  %251 = vmin.xlane.f32.xlu2 %v250_v52  ;;  %v303_v53 = vld [vmem:[#allocation4 + $0x8] sm:$0xff]  ;;  %v269_v24 = vshll.u32 %v268_v21, 16  ;;  %v255_v25 = vshll.u32 %v254_v22, 16 }
 0x320   :  { %405 = vlog2.f32 %v303_v53  ;;  %v308_v60 = vadd.f32 %v305_v57, %v300_v59 }
 0x322   :  { %v312_v1 = vsub.f32 %v308_v60, %v310_v63 }
 0x324   :  { %v314_v10 = vmul.f32 %v373_v3, %v312_v1 }
 0x326   :  { %v406_v62 = vpop.eup %405  ;;  %v316_v12 = vsel %vm111_vm8, %v314_v10, 0.0 }
 0x327   :  { %v307_v0 = vmul.f32 0.6931472, %v406_v62 }
 0x329   :  { %v309_v6 = vadd.f32 %v307_v0, %v301_v5 }
 0x32b   :  { %v313_v9 = vsub.f32 %v309_v6, %v311_v8 }
 0x32d   :  { %v315_v11 = vmul.f32 %v374_v7, %v313_v9 }
 0x32f   :  { %v317_v13 = vsel %vm111_vm8, %v315_v11, 0.0 }
 0x330   :  { %v318_v14 = vadd.f32 %v317_v13, %v316_v12 }
 0x332   :  { %v319_v15 = vrot.slane %v318_v14, 4 }
 0x334   :  { %v320_v16 = vadd.f32 %v319_v15, %v318_v14 }
 0x336   :  { %v321_v17 = vrot.slane %v320_v16, 2 }
 0x338   :  { %v322_v18 = vadd.f32 %v321_v17, %v320_v16 }
 0x33a   :  { %v323_v19 = vrot.slane %v322_v18, 1 }
 0x33c   :  { %v324_v20 = vadd.f32 %v323_v19, %v322_v18 }
 0x33e   :  { %327 = vperm.xlu1 %386, %v324_v20  }
 0x392   :  { %v266_v23 = vpop.xlane.xlu0 %265  ;;  %v252_v56 = vpop.xlane.xlu2 %251 }
 0x393   :  { %v267_v26 = vcvt.f32.s32 %v266_v23  ;;  %v253_v27 = vcvt.f32.s32 %v252_v56 }
 0x395   :  { %v270_v30 = vadd.s32 %v269_v24, %v267_v26  ;;  %v256_v31 = vadd.s32 %v255_v25, %v253_v27 }
 0x397   :  { %v280_v32 = vsel %vm274_vm11, %v270_v30, %v278_v28  ;;  %v279_v33 = vsel %vm273_vm9, %v256_v31, %v277_v29 }
 0x398   :  { %282 = vst.msk [vmem:[#allocation7 + $0x8] sm:$0xff] %vm111_vm8, %v280_v32 }
 0x399   :  { %281 = vst.msk [vmem:[#allocation7] sm:$0xff] %vm111_vm8, %v279_v33 }
 0x39f   :  { %v334_v34 = vld [vmem:[#allocation7 + $0x8] sm:$0xff] }
 0x3a0   :  { %v336_v35 = vsel %vm332_vm3, 0, %v334_v34  ;;  %v333_v36 = vld [vmem:[#allocation7] sm:$0xff] }
 0x3a1   :  { %338 = vst.msk [vmem:[%s621_s7 + $0x8] sm:$0xff] %vm111_vm8, %v336_v35  ;;  %v335_v2 = vsel %vm331_vm4, 0, %v333_v36 }
 0x3a2   :  { %337 = vst.msk [vmem:[%s621_s7] sm:$0xff] %vm111_vm8, %v335_v2 }
 0x3b0   :  { %v328_v54 = vpop.permute.xlu1 %327 }
 0x3b1   :  { %330 = vst [vmem:[#allocation11] sm:$0x1] %v328_v54 }
 0x3b2   :  { %349 = dma.vmem_to_hbm [thread:$0]  %s345_s21, 16, %s347_s24, [#allocation10]  }
 0x3b3   :  { %457 = dma.done.wait [#allocation10], 16  }
 0x3b4   :  { %458 = vsyncadd [#allocation10], 4294967280 }
 0x3b5   :  { %358 = vsyncpa [#allocation9], 1 }
 0x3b6   :  { %359 = vsyncpa [#allocation10], 1 }

</bundles_post_ra>
